<compile_context>
chip_gen: v7x
topology: tpu7x:2x2x1
jax: 0.10.0
libtpu: 0.0.40
codegen_flags: <defaults>
</compile_context>

<pallas_src>
import functools

import jax
import jax.numpy as jnp
import numpy as np
from jax import lax
from jax.experimental import pallas as pl
from jax.experimental.pallas import tpu as pltpu

NEG_INF = -1e30  # finite "masked" score; exp(NEG_INF - m) underflows to 0.


# --------------------------------------------------------------------------
# Fused kernel: all hops for one batch sample, entirely in VMEM / vregs.
# --------------------------------------------------------------------------
def _gat_fused_kernel(x_ref, adj_ref, *refs, num_layers, slope, mxu_dtype):
    """refs = (wk0, bk0, wv0, bv0, wk1, bk1, wv1, bv1, ..., out_ref).

    x_ref   : (1, N, F)  f32
    adj_ref : (1, N, N)  int8, adj[dst, src]
    wk/wv   : (F_l, H)   f32;  bk/bv : (1, H) f32
    out_ref : (1, N, H)  f32
    """
    param_refs = refs[:-1]
    out_ref = refs[-1]
    approx_recip = mxu_dtype != jnp.float32

    h = x_ref[0]                                   # (N, F) f32
    # int8 -> bool directly (no per-element int8->f32 convert).
    mask = adj_ref[0] != 0                         # (N, N) bool

    for l in range(num_layers):
        wk_ref, bk_ref, wv_ref, bv_ref = param_refs[4 * l:4 * l + 4]
        hm = h.astype(mxu_dtype)

        # Separate key / value projections: two small MXU passes and no
        # sub-128-lane slicing of a fused (N, 2H) block afterwards.
        hk = (jnp.dot(hm, wk_ref[...].astype(mxu_dtype),
                      preferred_element_type=jnp.float32) + bk_ref[...])
        hv = (jnp.dot(hm, wv_ref[...].astype(mxu_dtype),
                      preferred_element_type=jnp.float32) + bv_ref[...])

        # scores[dst, src] = <hk[dst], hk[src]>; contract dim 1 of BOTH
        # operands so no explicit transpose of hk is materialized.
        # TODO(synk): verify via pl.lower_as_mlir that this lowers without a
        # vxpose; if not, keep hk pre-transposed as (H, N).
        scores = lax.dot_general(
            hk.astype(mxu_dtype), hk.astype(mxu_dtype),
            dimension_numbers=(((1,), (1,)), ((), ())),
            preferred_element_type=jnp.float32)    # (N, N) f32

        # Masked softmax over src (incoming edges).  NEG_INF is finite, so
        # exp(masked - m) underflows to exactly 0 and no second mask is
        # needed; every row has >=1 edge (self-loops in the test graphs).
        # TODO(synk): DGL leaves zero-in-degree nodes untouched; not modeled.
        scores = jnp.where(mask, scores, NEG_INF)
        m = jnp.max(scores, axis=-1, keepdims=True)      # (N, 1)
        p = jnp.exp(scores - m)                          # (N, N)
        denom = jnp.sum(p, axis=-1, keepdims=True)       # (N, 1)

        # Aggregate first, normalize on the small (N, H) result (N*H muls
        # instead of N*N); reciprocal goes to the otherwise-idle EUP slot.
        h_att = jnp.dot(p.astype(mxu_dtype), hv.astype(mxu_dtype),
                        preferred_element_type=jnp.float32)
        h_att = h_att * pl.reciprocal(jnp.maximum(denom, 1e-30),
                                      approx=approx_recip)
        h = jnp.where(h_att > 0, h_att, slope * h_att)   # LeakyReLU

    # TODO(synk): with H=32 this is a masked (32-lane) store; pad nhid to a
    # multiple of 128 (or fold rows wrapper-side) for lane-dense vst at scale.
    out_ref[0] = h.astype(out_ref.dtype)


# --------------------------------------------------------------------------
# Wrapper: one pallas_call for the whole GAT forward.
# --------------------------------------------------------------------------
def gat_forward(x_key, adj, params, *, slope=0.2, mxu_dtype=jnp.bfloat16):
    """x_key: (B, N, F) f32; adj: (B, N, N) int8; params: [(wk, bk, wv, bv)].

    Returns (B, N, nhid) f32.  The whole forward is one pallas_call with
    grid=(B,): projections, masked softmax, aggregation and both hops stay in
    VMEM (no intermediate HBM traffic, no per-layer launch overhead).
    """
    B, N, F = x_key.shape
    H_out = params[-1][0].shape[1]
    num_layers = len(params)

    in_specs = [
        pl.BlockSpec((1, N, F), lambda b: (b, 0, 0)),   # this sample's x
        pl.BlockSpec((1, N, N), lambda b: (b, 0, 0)),   # this sample's adj
    ]
    flat_params = []
    flops = 0
    param_bytes = 0
    fin = F
    for (wk, bk, wv, bv) in params:
        Hl = wk.shape[1]
        for p2 in (wk, bk.reshape(1, -1), wv, bv.reshape(1, -1)):
            flat_params.append(p2)
            in_specs.append(pl.BlockSpec(p2.shape, lambda b: (0, 0)))
            param_bytes += 4 * p2.size
        flops += B * (4 * N * fin * Hl + 4 * N * N * Hl)
        fin = Hl

    cost = pl.CostEstimate(
        flops=flops,
        transcendentals=B * num_layers * N * N,
        bytes_accessed=(4 * B * N * F + B * N * N + param_bytes
                        + 4 * B * N * H_out),
    )
    kernel = functools.partial(_gat_fused_kernel, num_layers=num_layers,
                               slope=slope, mxu_dtype=mxu_dtype)

    # TODO(synk): for large N, add a src-tile grid axis with online-softmax
    # accumulators (v7x 64 MiB VMEM) and bit-pack adj to 1 bit/edge (v5e HBM).
    return pl.pallas_call(
        kernel,
        out_shape=jax.ShapeDtypeStruct((B, N, H_out), jnp.float32),
        grid_spec=pltpu.PrefetchScalarGridSpec(
            num_scalar_prefetch=0,
            grid=(B,),
            in_specs=in_specs,
            out_specs=pl.BlockSpec((1, N, H_out), lambda b: (b, 0, 0)),
        ),
        compiler_params=pltpu.CompilerParams(
            dimension_semantics=("parallel",)),   # >=2 points: both v7x TCs
        cost_estimate=cost,
    )(x_key, adj, *flat_params)


# --------------------------------------------------------------------------
# Pure-JAX reference (mirrors the DGL message passing with a dense mask).
# mxu_dtype rounds matmul operands the same way the kernel's MXU path does.
# --------------------------------------------------------------------------
def gat_reference(x_key, adj, params, *, slope=0.2, mxu_dtype=jnp.float32):
    def rd(a):  # emulate "mxu_dtype operands, f32 accumulation"
        return a.astype(mxu_dtype).astype(jnp.float32)

    out = x_key
    mask = adj != 0
    for (wk, bk, wv, bv) in params:
        hk = jnp.einsum('bnf,fh->bnh', rd(out), rd(wk)) + bk
        hv = jnp.einsum('bnf,fh->bnh', rd(out), rd(wv)) + bv
        s = jnp.einsum('bqh,bkh->bqk', rd(hk), rd(hk))
        s = jnp.where(mask, s, NEG_INF)
        p = jnp.exp(s - jnp.max(s, axis=-1, keepdims=True))
        p = jnp.where(mask, p, 0.0)
        alpha = p / jnp.sum(p, axis=-1, keepdims=True)
        h_att = jnp.einsum('bqk,bkh->bqh', rd(alpha), rd(hv))
        out = jnp.where(h_att > 0, h_att, slope * h_att)
    return out


def init_linear(key, fan_in, fan_out):
    # torch.nn.Linear default init: U(-1/sqrt(fan_in), 1/sqrt(fan_in)).
    kw, kb = jax.random.split(key)
    bound = 1.0 / np.sqrt(fan_in)
    w = jax.random.uniform(kw, (fan_in, fan_out), jnp.float32, -bound, bound)
    b = jax.random.uniform(kb, (fan_out,), jnp.float32, -bound, bound)
    return w, b


if __name__ == "__main__":
    key = jax.random.PRNGKey(0)
    B, N, in_feat, nhid, hopnum = 2, 64, 16, 32, 2
    alpha_slope = 0.2

    k_x, k_adj, k_p = jax.random.split(key, 3)

    # Inputs.
    x_key = jax.random.normal(k_x, (B, N, in_feat), jnp.float32)

    # Per-sample graphs: ~30% density + guaranteed self-loops, int8 adjacency.
    adj = jax.random.uniform(k_adj, (B, N, N)) < 0.3
    adj = jnp.logical_or(adj, jnp.eye(N, dtype=bool)[None])
    adj = adj.astype(jnp.int8)

    # Parameters for hopnum stacked layers.
    params = []
    fin = in_feat
    for _ in range(hopnum):
        k_p, kk, kv = jax.random.split(k_p, 3)
        wk, bk = init_linear(kk, fin, nhid)
        wv, bv = init_linear(kv, fin, nhid)
        params.append((wk, bk, wv, bv))
        fin = nhid

    # Strict semantic check: f32 MXU path vs f32 reference.
    out_f32 = jax.block_until_ready(
        gat_forward(x_key, adj, params, slope=alpha_slope,
                    mxu_dtype=jnp.float32))
    ref_f32 = gat_reference(x_key, adj, params, slope=alpha_slope,
                            mxu_dtype=jnp.float32)
    np.testing.assert_allclose(np.asarray(out_f32), np.asarray(ref_f32),
                               rtol=1e-4, atol=1e-4)

    # Perf path: bf16 MXU operands (f32 accumulation) vs bf16-rounded ref.
    out_bf16 = jax.block_until_ready(
        gat_forward(x_key, adj, params, slope=alpha_slope,
                    mxu_dtype=jnp.bfloat16))
    ref_bf16 = gat_reference(x_key, adj, params, slope=alpha_slope,
                             mxu_dtype=jnp.bfloat16)
    np.testing.assert_allclose(np.asarray(out_bf16), np.asarray(ref_bf16),
                               rtol=1e-2, atol=1e-2)

    assert out_bf16.shape == (B, N, nhid)
    print("KERNEL_OK")
</pallas_src>

<mosaic_0001>
module attributes {stable_mosaic.version = 11 : i64} {
  func.func @_gat_fused_kernel(%arg0: i32, %arg1: memref<1x64x16xf32, #tpu.memory_space<vmem>>, %arg2: memref<1x64x64xi8, #tpu.memory_space<vmem>>, %arg3: memref<16x32xf32, #tpu.memory_space<vmem>>, %arg4: memref<1x32xf32, #tpu.memory_space<vmem>>, %arg5: memref<16x32xf32, #tpu.memory_space<vmem>>, %arg6: memref<1x32xf32, #tpu.memory_space<vmem>>, %arg7: memref<32x32xf32, #tpu.memory_space<vmem>>, %arg8: memref<1x32xf32, #tpu.memory_space<vmem>>, %arg9: memref<32x32xf32, #tpu.memory_space<vmem>>, %arg10: memref<1x32xf32, #tpu.memory_space<vmem>>, %arg11: memref<1x64x32xf32, #tpu.memory_space<vmem>>) attributes {dimension_semantics = [#tpu.dimension_semantics<parallel>], iteration_bounds = array<i64: 2>, scalar_prefetch = 0 : i64, scratch_operands = 0 : i64, tpu.core_type = #tpu.core_type<tc>, window_params = [{transform_indices = @transform_0, window_bounds = array<i64: 1, 64, 16>}, {transform_indices = @transform_1, window_bounds = array<i64: 1, 64, 64>}, {pipeline_mode = #tpu.pipeline_mode<synchronous>, transform_indices = @transform_2, window_bounds = array<i64: 16, 32>}, {pipeline_mode = #tpu.pipeline_mode<synchronous>, transform_indices = @transform_3, window_bounds = array<i64: 1, 32>}, {pipeline_mode = #tpu.pipeline_mode<synchronous>, transform_indices = @transform_4, window_bounds = array<i64: 16, 32>}, {pipeline_mode = #tpu.pipeline_mode<synchronous>, transform_indices = @transform_5, window_bounds = array<i64: 1, 32>}, {pipeline_mode = #tpu.pipeline_mode<synchronous>, transform_indices = @transform_6, window_bounds = array<i64: 32, 32>}, {pipeline_mode = #tpu.pipeline_mode<synchronous>, transform_indices = @transform_7, window_bounds = array<i64: 1, 32>}, {pipeline_mode = #tpu.pipeline_mode<synchronous>, transform_indices = @transform_8, window_bounds = array<i64: 32, 32>}, {pipeline_mode = #tpu.pipeline_mode<synchronous>, transform_indices = @transform_9, window_bounds = array<i64: 1, 32>}, {transform_indices = @transform_10, window_bounds = array<i64: 1, 64, 32>}]} {
    %c0 = arith.constant 0 : index
    %c0_0 = arith.constant 0 : index
    %c0_1 = arith.constant 0 : index
    %0 = vector.load %arg1[%c0, %c0_0, %c0_1] : memref<1x64x16xf32, #tpu.memory_space<vmem>>, vector<1x64x16xf32>
    %1 = vector.shape_cast %0 : vector<1x64x16xf32> to vector<64x16xf32>
    %c0_2 = arith.constant 0 : index
    %c0_3 = arith.constant 0 : index
    %c0_4 = arith.constant 0 : index
    %2 = vector.load %arg2[%c0_2, %c0_3, %c0_4] : memref<1x64x64xi8, #tpu.memory_space<vmem>>, vector<1x64x64xi8>
    %3 = vector.shape_cast %2 : vector<1x64x64xi8> to vector<64x64xi8>
    %c0_i8 = arith.constant 0 : i8
    %4 = vector.broadcast %c0_i8 : i8 to vector<64x64xi8>
    %5 = arith.cmpi ne, %3, %4 : vector<64x64xi8>
    %c0_5 = arith.constant 0 : index
    %c0_6 = arith.constant 0 : index
    %6 = vector.load %arg3[%c0_5, %c0_6] : memref<16x32xf32, #tpu.memory_space<vmem>>, vector<16x32xf32>
    %cst = arith.constant dense<0.000000e+00> : vector<64x32xf32>
    %7 = tpu.matmul %1, %6, %cst {dimension_numbers = #tpu.dot_dimension_numbers<[1], [0], [0], [1], [0, 0, 1, 1], [], []>} : vector<64x16xf32>, vector<16x32xf32>, vector<64x32xf32> -> vector<64x32xf32>
    %c0_7 = arith.constant 0 : index
    %c0_8 = arith.constant 0 : index
    %8 = vector.load %arg4[%c0_7, %c0_8] : memref<1x32xf32, #tpu.memory_space<vmem>>, vector<1x32xf32>
    %9 = vector.broadcast %8 : vector<1x32xf32> to vector<64x32xf32>
    %10 = arith.addf %7, %9 : vector<64x32xf32>
    %c0_9 = arith.constant 0 : index
    %c0_10 = arith.constant 0 : index
    %11 = vector.load %arg5[%c0_9, %c0_10] : memref<16x32xf32, #tpu.memory_space<vmem>>, vector<16x32xf32>
    %cst_11 = arith.constant dense<0.000000e+00> : vector<64x32xf32>
    %12 = tpu.matmul %1, %11, %cst_11 {dimension_numbers = #tpu.dot_dimension_numbers<[1], [0], [0], [1], [0, 0, 1, 1], [], []>} : vector<64x16xf32>, vector<16x32xf32>, vector<64x32xf32> -> vector<64x32xf32>
    %c0_12 = arith.constant 0 : index
    %c0_13 = arith.constant 0 : index
    %13 = vector.load %arg6[%c0_12, %c0_13] : memref<1x32xf32, #tpu.memory_space<vmem>>, vector<1x32xf32>
    %14 = vector.broadcast %13 : vector<1x32xf32> to vector<64x32xf32>
    %15 = arith.addf %12, %14 : vector<64x32xf32>
    %cst_14 = arith.constant dense<0.000000e+00> : vector<64x64xf32>
    %16 = tpu.matmul %10, %10, %cst_14 {dimension_numbers = #tpu.dot_dimension_numbers<[1], [1], [0], [0], [0, 0, 1, 0], [], []>} : vector<64x32xf32>, vector<64x32xf32>, vector<64x64xf32> -> vector<64x64xf32>
    %cst_15 = arith.constant -1.000000e+30 : f32
    %17 = vector.broadcast %cst_15 : f32 to vector<64x64xf32>
    %18 = arith.select %5, %16, %17 : vector<64x64xi1>, vector<64x64xf32>
    %cst_16 = arith.constant dense<0xFF800000> : vector<64xf32>
    %19 = vector.multi_reduction <maximumf>, %18, %cst_16 [1] : vector<64x64xf32> to vector<64xf32>
    %20 = vector.shape_cast %19 : vector<64xf32> to vector<64x1xf32>
    %21 = vector.broadcast %20 : vector<64x1xf32> to vector<64x64xf32>
    %22 = arith.subf %18, %21 : vector<64x64xf32>
    %23 = math.exp %22 : vector<64x64xf32>
    %cst_17 = arith.constant dense<0.000000e+00> : vector<64xf32>
    %24 = vector.multi_reduction <add>, %23, %cst_17 [1] : vector<64x64xf32> to vector<64xf32>
    %25 = vector.shape_cast %24 : vector<64xf32> to vector<64x1xf32>
    %cst_18 = arith.constant dense<0.000000e+00> : vector<64x32xf32>
    %26 = tpu.matmul %23, %15, %cst_18 {dimension_numbers = #tpu.dot_dimension_numbers<[1], [0], [0], [1], [0, 0, 1, 1], [], []>} : vector<64x64xf32>, vector<64x32xf32>, vector<64x32xf32> -> vector<64x32xf32>
    %cst_19 = arith.constant 1.000000e-30 : f32
    %27 = vector.broadcast %cst_19 : f32 to vector<64x1xf32>
    %28 = arith.maximumf %25, %27 : vector<64x1xf32>
    %29 = tpu.reciprocal %28 : vector<64x1xf32> -> vector<64x1xf32>
    %30 = vector.broadcast %29 : vector<64x1xf32> to vector<64x32xf32>
    %31 = arith.mulf %26, %30 : vector<64x32xf32>
    %cst_20 = arith.constant 0.000000e+00 : f32
    %32 = vector.broadcast %cst_20 : f32 to vector<64x32xf32>
    %33 = arith.cmpf ogt, %31, %32 : vector<64x32xf32>
    %cst_21 = arith.constant 2.000000e-01 : f32
    %34 = vector.broadcast %cst_21 : f32 to vector<64x32xf32>
    %35 = arith.mulf %34, %31 : vector<64x32xf32>
    %36 = arith.select %33, %31, %35 : vector<64x32xi1>, vector<64x32xf32>
    %c0_22 = arith.constant 0 : index
    %c0_23 = arith.constant 0 : index
    %37 = vector.load %arg7[%c0_22, %c0_23] : memref<32x32xf32, #tpu.memory_space<vmem>>, vector<32x32xf32>
    %cst_24 = arith.constant dense<0.000000e+00> : vector<64x32xf32>
    %38 = tpu.matmul %36, %37, %cst_24 {dimension_numbers = #tpu.dot_dimension_numbers<[1], [0], [0], [1], [0, 0, 1, 1], [], []>} : vector<64x32xf32>, vector<32x32xf32>, vector<64x32xf32> -> vector<64x32xf32>
    %c0_25 = arith.constant 0 : index
    %c0_26 = arith.constant 0 : index
    %39 = vector.load %arg8[%c0_25, %c0_26] : memref<1x32xf32, #tpu.memory_space<vmem>>, vector<1x32xf32>
    %40 = vector.broadcast %39 : vector<1x32xf32> to vector<64x32xf32>
    %41 = arith.addf %38, %40 : vector<64x32xf32>
    %c0_27 = arith.constant 0 : index
    %c0_28 = arith.constant 0 : index
    %42 = vector.load %arg9[%c0_27, %c0_28] : memref<32x32xf32, #tpu.memory_space<vmem>>, vector<32x32xf32>
    %cst_29 = arith.constant dense<0.000000e+00> : vector<64x32xf32>
    %43 = tpu.matmul %36, %42, %cst_29 {dimension_numbers = #tpu.dot_dimension_numbers<[1], [0], [0], [1], [0, 0, 1, 1], [], []>} : vector<64x32xf32>, vector<32x32xf32>, vector<64x32xf32> -> vector<64x32xf32>
    %c0_30 = arith.constant 0 : index
    %c0_31 = arith.constant 0 : index
    %44 = vector.load %arg10[%c0_30, %c0_31] : memref<1x32xf32, #tpu.memory_space<vmem>>, vector<1x32xf32>
    %45 = vector.broadcast %44 : vector<1x32xf32> to vector<64x32xf32>
    %46 = arith.addf %43, %45 : vector<64x32xf32>
    %cst_32 = arith.constant dense<0.000000e+00> : vector<64x64xf32>
    %47 = tpu.matmul %41, %41, %cst_32 {dimension_numbers = #tpu.dot_dimension_numbers<[1], [1], [0], [0], [0, 0, 1, 0], [], []>} : vector<64x32xf32>, vector<64x32xf32>, vector<64x64xf32> -> vector<64x64xf32>
    %cst_33 = arith.constant -1.000000e+30 : f32
    %48 = vector.broadcast %cst_33 : f32 to vector<64x64xf32>
    %49 = arith.select %5, %47, %48 : vector<64x64xi1>, vector<64x64xf32>
    %cst_34 = arith.constant dense<0xFF800000> : vector<64xf32>
    %50 = vector.multi_reduction <maximumf>, %49, %cst_34 [1] : vector<64x64xf32> to vector<64xf32>
    %51 = vector.shape_cast %50 : vector<64xf32> to vector<64x1xf32>
    %52 = vector.broadcast %51 : vector<64x1xf32> to vector<64x64xf32>
    %53 = arith.subf %49, %52 : vector<64x64xf32>
    %54 = math.exp %53 : vector<64x64xf32>
    %cst_35 = arith.constant dense<0.000000e+00> : vector<64xf32>
    %55 = vector.multi_reduction <add>, %54, %cst_35 [1] : vector<64x64xf32> to vector<64xf32>
    %56 = vector.shape_cast %55 : vector<64xf32> to vector<64x1xf32>
    %cst_36 = arith.constant dense<0.000000e+00> : vector<64x32xf32>
    %57 = tpu.matmul %54, %46, %cst_36 {dimension_numbers = #tpu.dot_dimension_numbers<[1], [0], [0], [1], [0, 0, 1, 1], [], []>} : vector<64x64xf32>, vector<64x32xf32>, vector<64x32xf32> -> vector<64x32xf32>
    %cst_37 = arith.constant 1.000000e-30 : f32
    %58 = vector.broadcast %cst_37 : f32 to vector<64x1xf32>
    %59 = arith.maximumf %56, %58 : vector<64x1xf32>
    %60 = tpu.reciprocal %59 : vector<64x1xf32> -> vector<64x1xf32>
    %61 = vector.broadcast %60 : vector<64x1xf32> to vector<64x32xf32>
    %62 = arith.mulf %57, %61 : vector<64x32xf32>
    %cst_38 = arith.constant 0.000000e+00 : f32
    %63 = vector.broadcast %cst_38 : f32 to vector<64x32xf32>
    %64 = arith.cmpf ogt, %62, %63 : vector<64x32xf32>
    %cst_39 = arith.constant 2.000000e-01 : f32
    %65 = vector.broadcast %cst_39 : f32 to vector<64x32xf32>
    %66 = arith.mulf %65, %62 : vector<64x32xf32>
    %67 = arith.select %64, %62, %66 : vector<64x32xi1>, vector<64x32xf32>
    %c0_40 = arith.constant 0 : index
    %c0_41 = arith.constant 0 : index
    %c0_42 = arith.constant 0 : index
    %68 = vector.load %arg11[%c0_40, %c0_41, %c0_42] : memref<1x64x32xf32, #tpu.memory_space<vmem>>, vector<1x64x32xf32>
    %69 = vector.shape_cast %68 : vector<1x64x32xf32> to vector<64x32xf32>
    %70 = vector.shape_cast %67 : vector<64x32xf32> to vector<1x64x32xf32>
    tpu.vector_store %arg11[%c0_40, %c0_41, %c0_42], %70 {strides = array<i32>} : memref<1x64x32xf32, #tpu.memory_space<vmem>>, vector<1x64x32xf32>,
    return
  }
  func.func @transform_0(%arg0: i32) -> (i32, i32, i32) {
    %c0_i32 = arith.constant 0 : i32
    %c0_i32_0 = arith.constant 0 : i32
    %c0_i32_1 = arith.constant 0 : i32
    return %arg0, %c0_i32, %c0_i32_0 : i32, i32, i32
  }
  func.func @transform_1(%arg0: i32) -> (i32, i32, i32) {
    %c0_i32 = arith.constant 0 : i32
    %c0_i32_0 = arith.constant 0 : i32
    %c0_i32_1 = arith.constant 0 : i32
    return %arg0, %c0_i32, %c0_i32_0 : i32, i32, i32
  }
  func.func @transform_2(%arg0: i32) -> (i32, i32) {
    %c0_i32 = arith.constant 0 : i32
    %c0_i32_0 = arith.constant 0 : i32
    %c0_i32_1 = arith.constant 0 : i32
    return %c0_i32, %c0_i32_0 : i32, i32
  }
  func.func @transform_3(%arg0: i32) -> (i32, i32) {
    %c0_i32 = arith.constant 0 : i32
    %c0_i32_0 = arith.constant 0 : i32
    %c0_i32_1 = arith.constant 0 : i32
    return %c0_i32, %c0_i32_0 : i32, i32
  }
  func.func @transform_4(%arg0: i32) -> (i32, i32) {
    %c0_i32 = arith.constant 0 : i32
    %c0_i32_0 = arith.constant 0 : i32
    %c0_i32_1 = arith.constant 0 : i32
    return %c0_i32, %c0_i32_0 : i32, i32
  }
  func.func @transform_5(%arg0: i32) -> (i32, i32) {
    %c0_i32 = arith.constant 0 : i32
    %c0_i32_0 = arith.constant 0 : i32
    %c0_i32_1 = arith.constant 0 : i32
    return %c0_i32, %c0_i32_0 : i32, i32
  }
  func.func @transform_6(%arg0: i32) -> (i32, i32) {
    %c0_i32 = arith.constant 0 : i32
    %c0_i32_0 = arith.constant 0 : i32
    %c0_i32_1 = arith.constant 0 : i32
    return %c0_i32, %c0_i32_0 : i32, i32
  }
  func.func @transform_7(%arg0: i32) -> (i32, i32) {
    %c0_i32 = arith.constant 0 : i32
    %c0_i32_0 = arith.constant 0 : i32
    %c0_i32_1 = arith.constant 0 : i32
    return %c0_i32, %c0_i32_0 : i32, i32
  }
  func.func @transform_8(%arg0: i32) -> (i32, i32) {
    %c0_i32 = arith.constant 0 : i32
    %c0_i32_0 = arith.constant 0 : i32
    %c0_i32_1 = arith.constant 0 : i32
    return %c0_i32, %c0_i32_0 : i32, i32
  }
  func.func @transform_9(%arg0: i32) -> (i32, i32) {
    %c0_i32 = arith.constant 0 : i32
    %c0_i32_0 = arith.constant 0 : i32
    %c0_i32_1 = arith.constant 0 : i32
    return %c0_i32, %c0_i32_0 : i32, i32
  }
  func.func @transform_10(%arg0: i32) -> (i32, i32, i32) {
    %c0_i32 = arith.constant 0 : i32
    %c0_i32_0 = arith.constant 0 : i32
    %c0_i32_1 = arith.constant 0 : i32
    return %arg0, %c0_i32, %c0_i32_0 : i32, i32, i32
  }
}

</mosaic_0001>

<bundles_post_ra>
// kernel: tpu_custom_call.1
= control target key start
LH: loop header
LB: loop body
LE: loop exit
PB: predicated region body
PF: predicated region fallthrough
CT: control target
= control target key end

     0   :  { %s2443_s13 = smov 0   ;;  %s2755_s0 = inlined_call_operand.vmem [shape: f32[2,64,16], index: 0, kind: input, shape index: {}]   ;;  %s2756_s1 = inlined_call_operand.vmem [shape: s8[2,64,64], index: 1, kind: input, shape index: {}]   ;;  %s2757_s2 = inlined_call_operand.vmem [shape: f32[16,32], index: 2, kind: input, shape index: {}]   ;;  %s2758_s3 = inlined_call_operand.vmem [shape: f32[1,32], index: 3, kind: input, shape index: {}]   ;;  %s2759_s4 = inlined_call_operand.vmem [shape: f32[16,32], index: 4, kind: input, shape index: {}]   ;;  %s2760_s5 = inlined_call_operand.vmem [shape: f32[1,32], index: 5, kind: input, shape index: {}]   ;;  %s2761_s6 = inlined_call_operand.vmem [shape: f32[32,32], index: 6, kind: input, shape index: {}]   ;;  %s2762_s7 = inlined_call_operand.vmem [shape: f32[1,32], index: 7, kind: input, shape index: {}]   ;;  %s2763_s8 = inlined_call_operand.vmem [shape: f32[32,32], index: 8, kind: input, shape index: {}]   ;;  %s2764_s9 = inlined_call_operand.vmem [shape: f32[1,32], index: 9, kind: input, shape index: {}]   ;;  %s2765_s10 = inlined_call_operand.vmem [shape: f32[2,64,32], index: 10, kind: output, shape index: {}]  }
   0x1 LB: > { %s1810_s14 = sadd.s32 4294967295, %s2385_s13   ;;  %p1814_p0 = scmp.ge.s32.totalorder %s2385_s13, 1  ;;  %s2385_s13 = sphi %s2443_s13, %s20_s13  }
   0x2   : > { %p322_p1 = scmp.lt.s32.totalorder %s2385_s13, 3 }
   0x4   : > { %p323_p2 = pnand %p1814_p0, %p322_p1 }
   0x5   : > { %v394_v0 = vld [vmem:[%s2757_s2] sm:$0xff] (!%p323_p2)  ;;  %v395_v1 = vld [vmem:[%s2757_s2 + $0x8] sm:$0xff] (!%p323_p2)  ;;  %p365_p3 = scmp.lt.s32.totalorder (!%p323_p2), %s1810_s14, 1  ;;  %vm403_vm0 = vcmask (!%p323_p2), 130048   ;;  %vm647_vm1 = vcmask (!%p323_p2), 261120   ;;  %v2387_v48 = vmov (!%p323_p2), 0  }
   0x6   : > { %326 = sbr.rel (%p323_p2) target bundleno = 1715 (0x6b3), region = 60  ;;  %v2202_v2 = vpack.c.bf16 (!%p323_p2), %v395_v1, %v394_v0  ;;  %v533_v11 = vld [vmem:[%s2759_s4] sm:$0xff] (!%p323_p2)  ;;  %v534_v12 = vld [vmem:[%s2759_s4 + $0x8] sm:$0xff] (!%p323_p2)  ;;  %vm2492_vm2 = vmpackc.low (!%p323_p2), %vm647_vm1, %vm647_vm1  ;;  %vm843_vm12 = vcmask (!%p323_p2), 523264  }
   0x7   : > { %v2206_v13 = vpack.c.bf16 (!%p323_p2), %v534_v12, %v533_v11  ;;  %v1821_v14 = vld [vmem:[%s2758_s3] ss:$0 sm:$0xff] (!%p323_p2) }
   0x8   : > { %2203 = vmatprep.subr.bf16.mxu0 (!%p323_p2), %v2202_v2  ;;  %v2523_v37 = vld [vmem:[%s2760_s5] ss:$0 sm:$0xff] (!%p323_p2) }
   0x9   : > { %2205 = vmatpush3.bf16.msra.mxu0 (!%p323_p2), %v2202_v2  ;;  %2207 = vmatprep.subr.bf16.mxu1 (!%p323_p2), %v2206_v13 }
   0xa   : > { %2209 = vmatpush3.bf16.msra.mxu1 (!%p323_p2), %v2206_v13 }
   0xd   : > { %s2785_s14 = smov (!%p365_p3, %s1810_s14), 1 }
   0xe   : > { %s1907_s19 = sshll.u32 %s2785_s14, 6  ;;  %s1908_s11 = sshll.u32 %s2785_s14, 4 }
   0xf   : > { %s369_s22 = scalar_lea.vmem %s2755_s0, %s1907_s19  ;;  %s374_s16 = scalar_lea.vmem %s2756_s1, %s1908_s11 }
  0x10   : > { %v382_v3 = vld [vmem:[%s369_s22] sm:$0xff]  ;;  %v383_v4 = vld [vmem:[%s369_s22 + $0x8] sm:$0xff]  ;;  %v384_v5 = vld [vmem:[%s369_s22 + $0x10] sm:$0xff]  ;;  %s2734_s23 = scalar_lea.vmem %s2765_s10, %s1907_s19 }
  0x11   : > { %2022 = vmatprep.mubr.msk.f32.mxu0 %vm403_vm0, %v382_v3  ;;  %2038 = vmatprep.mubr.msk.f32.mxu1 %vm403_vm0, %v382_v3  ;;  %v385_v6 = vld [vmem:[%s369_s22 + $0x18] sm:$0xff]  ;;  %v386_v7 = vld [vmem:[%s369_s22 + $0x20] sm:$0xff]  ;;  %v387_v8 = vld [vmem:[%s369_s22 + $0x28] sm:$0xff] }
  0x12   : > { %2023 = vmatmul.mubr.msk.f32.vlgmr.msra.gmra.mrb[0].mxu0 %vm403_vm0, %v383_v4  ;;  %v388_v9 = vld [vmem:[%s369_s22 + $0x30] sm:$0xff]  ;;  %v389_v10 = vld [vmem:[%s369_s22 + $0x38] sm:$0xff]  ;;  %2039 = vmatmul.mubr.msk.f32.vlgmr.msra.gmra.mrb[0].mxu1 %vm403_vm0, %v383_v4  ;;  %v390_v47 = vld [vmem:[%s374_s16] sm:$0xff] }
  0x13   : > { %2025 = vmatprep.mubr.msk.f32.mxu0 %vm403_vm0, %v384_v5  ;;  %2041 = vmatprep.mubr.msk.f32.mxu1 %vm403_vm0, %v384_v5  ;;  %vm392_vm3 = vnez %v390_v47  ;;  %v391_v50 = vld [vmem:[%s374_s16 + $0x8] sm:$0xff] }
  0x14   : > { %v777_v49 = vsel %vm392_vm3, 16843009, %v2387_v48  ;;  %vm393_vm4 = vnez %v391_v50 }
  0x15   : > { %v779_v51 = vunpack.c.0.s8 %v777_v49  ;;  %v780_v52 = vunpack.c.1.s8 %v777_v49  ;;  %v781_v54 = vunpack.c.2.s8 %v777_v49  ;;  %v778_v55 = vsel %vm393_vm4, 16843009, %v2387_v48 }
  0x16   : > { %2026 = vmatmul.mubr.msk.f32.gmra.mrb[2].mxu0 %vm403_vm0, %v385_v6  ;;  %2042 = vmatmul.mubr.msk.f32.gmra.mrb[2].mxu1 %vm403_vm0, %v385_v6  ;;  %v782_v57 = vunpack.c.3.s8 %v777_v49  ;;  %v783_v60 = vunpack.c.0.s8 %v778_v55  ;;  %v784_v63 = vunpack.c.1.s8 %v778_v55  ;;  %v785_v2 = vunpack.c.2.s8 %v778_v55 }
  0x17   : > { %2028 = vmatprep.mubr.msk.f32.mxu0 %vm403_vm0, %v386_v7  ;;  %2044 = vmatprep.mubr.msk.f32.mxu1 %vm403_vm0, %v386_v7  ;;  %v787_v53 = vpack.c.b16 %v779_v51, %v779_v51  ;;  %v789_v56 = vpack.c.b16 %v780_v52, %v780_v52  ;;  %v791_v59 = vpack.c.b16 %v781_v54, %v781_v54  ;;  %v786_v5 = vunpack.c.3.s8 %v778_v55 }
  0x18   : > { %v793_v62 = vpack.c.b16 %v782_v57, %v782_v57  ;;  %v795_v1 = vpack.c.b16 %v783_v60, %v783_v60  ;;  %v797_v4 = vpack.c.b16 %v784_v63, %v784_v63 }
  0x19   : > { %v788_v58 = vpack.c.b8 %v787_v53, %v787_v53  ;;  %v790_v61 = vpack.c.b8 %v789_v56, %v789_v56  ;;  %v792_v0 = vpack.c.b8 %v791_v59, %v791_v59  ;;  %v801_v12 = vpack.c.b16 %v786_v5, %v786_v5 }
  0x1a   : > { %2029 = vmatmul.mubr.msk.f32.gmra.mrb[4].mxu0 %vm403_vm0, %v387_v8  ;;  %2045 = vmatmul.mubr.msk.f32.gmra.mrb[4].mxu1 %vm403_vm0, %v387_v8  ;;  %v794_v3 = vpack.c.b8 %v793_v62, %v793_v62  ;;  %v796_v7 = vpack.c.b8 %v795_v1, %v795_v1  ;;  %v799_v8 = vpack.c.b16 %v785_v2, %v785_v2 }
  0x1b   : > { %2031 = vmatprep.mubr.msk.f32.mxu0 %vm403_vm0, %v388_v9  ;;  %2047 = vmatprep.mubr.msk.f32.mxu1 %vm403_vm0, %v388_v9  ;;  %vm803_vm5 = vnez %v788_v58  ;;  %vm804_vm6 = vnez %v790_v61  ;;  %vm805_vm7 = vnez %v792_v0  ;;  %v798_v11 = vpack.c.b8 %v797_v4, %v797_v4 }
  0x1c   : > { %v811_v6 = vsel %vm803_vm5, 16843009, %v2387_v48  ;;  %v812_v9 = vsel %vm804_vm6, 16843009, %v2387_v48  ;;  %vm806_vm8 = vnez %v794_v3  ;;  %v813_v13 = vsel %vm805_vm7, 16843009, %v2387_v48 }
  0x1d   : > { %vm807_vm9 = vnez %v796_v7  ;;  %vm808_vm11 = vnez %v798_v11 }
  0x1e   : > { %2032 = vmatmul.mubr.msk.f32.gmra.mrb[6].mxu0 %vm403_vm0, %v389_v10  ;;  %2048 = vmatmul.mubr.msk.f32.gmra.mrb[6].mxu1 %vm403_vm0, %v389_v10  ;;  %v819_v10 = vunpack.c.0.s8 %v811_v6 }
  0x20   : > { %vm2539_vm10 = vcmp.ne.s32.totalorder %v819_v10, 0 }
  0xe5   : > { %v2024_v15 = vpop.f32.mrb[0].mxu0  ;;  %v2040_v36 = vpop.f32.mrb[0].mxu1 }
  0xe6   : > { %v500_v16 = vadd.f32 %v2024_v15, %v1821_v14  ;;  %v494_v17 = vpop.f32.mrb[1].mxu0  ;;  %v614_v38 = vadd.f32 %v2040_v36, %v2523_v37  ;;  %v608_v39 = vpop.f32.mrb[1].mxu1  ;;  %v800_v15 = vpack.c.b8 %v799_v8, %v799_v8 }
  0xe7   : > { %v495_v18 = vadd.f32 %v1821_v14, %v494_v17  ;;  %v609_v40 = vadd.f32 %v2523_v37, %v608_v39 }
  0xe8   : > { %vm809_vm14 = vnez %v800_v15 }
  0xe9   : > { %v2210_v20 = vpack.c.bf16 %v500_v16, %v495_v18  ;;  %2066 = vmatprep.mubr.msk.f32.mxu0 %vm647_vm1, %v495_v18  ;;  %v2027_v21 = vpop.f32.mrb[2].mxu0  ;;  %v2043_v41 = vpop.f32.mrb[2].mxu1  ;;  %v2234_v42 = vpack.c.bf16 %v614_v38, %v609_v40  ;;  %v821_v18 = vunpack.c.0.s8 %v813_v13 }
  0xea   : > { %v510_v22 = vadd.f32 %v2027_v21, %v1821_v14  ;;  %v504_v23 = vpop.f32.mrb[3].mxu0  ;;  %v624_v43 = vadd.f32 %v2043_v41, %v2523_v37  ;;  %v618_v44 = vpop.f32.mrb[3].mxu1 }
  0xeb   : > { %2212 = vmatprep.subr.msk.bf16.mxu0 %vm2492_vm2, %v2210_v20  ;;  %v505_v24 = vadd.f32 %v1821_v14, %v504_v23  ;;  %v619_v45 = vadd.f32 %v2523_v37, %v618_v44  ;;  %2235 = vmatprep.subr.bf16.mxu1 %v2234_v42  ;;  %vm2552_vm15 = vcmp.ne.s32.totalorder %v821_v18, 0 }
  0xec   : > { %2215 = vmatpush3.bf16.xpose.msk.msra.mxu0 %vm2492_vm2, %v2210_v20  ;;  %2237 = vmatpush3.bf16.msra.mxu1 %v2234_v42  ;;  %v802_v20 = vpack.c.b8 %v801_v12, %v801_v12 }
  0xed   : > { %v2216_v25 = vpack.c.bf16 %v510_v22, %v505_v24  ;;  %v2030_v26 = vpop.f32.mrb[4].mxu0  ;;  %v2238_v46 = vpack.c.bf16 %v624_v43, %v619_v45  ;;  %v2046_v62 = vpop.f32.mrb[4].mxu1 }
  0xee   : > { %v520_v27 = vadd.f32 %v2030_v26, %v1821_v14  ;;  %v514_v28 = vpop.f32.mrb[5].mxu0  ;;  %vm810_vm0 = vnez %v802_v20  ;;  %v634_v63 = vadd.f32 %v2046_v62, %v2523_v37  ;;  %v628_v0 = vpop.f32.mrb[5].mxu1 }
  0xef   : > { %2218 = vmatprep.subr.msk.bf16.mxu0 %vm2492_vm2, %v2216_v25  ;;  %v515_v29 = vadd.f32 %v1821_v14, %v514_v28  ;;  %2239 = vmatprep.subr.bf16.mxu1 %v2238_v46  ;;  %v818_v39 = vsel %vm810_vm0, 16843009, %v2387_v48  ;;  %v629_v1 = vadd.f32 %v2523_v37, %v628_v0  ;;  %v1234_v0 = vld [vmem:[%s2763_s8 + $0x8] sm:$0xff] }
  0xf0   : > { %2241 = vmatpush3.bf16.msra.mxu1 %v2238_v46 }
  0xf1   : > { %v2222_v30 = vpack.c.bf16 %v520_v27, %v515_v29  ;;  %v2033_v31 = vpop.f32.mrb[6].mxu0  ;;  %v2242_v2 = vpack.c.bf16 %v634_v63, %v629_v1  ;;  %v2049_v3 = vpop.f32.mrb[6].mxu1  ;;  %v1233_v63 = vld [vmem:[%s2763_s8] sm:$0xff] }
  0xf2   : > { %v530_v32 = vadd.f32 %v2033_v31, %v1821_v14  ;;  %v524_v33 = vpop.f32.mrb[7].mxu0  ;;  %v644_v4 = vadd.f32 %v2049_v3, %v2523_v37  ;;  %v638_v5 = vpop.f32.mrb[7].mxu1  ;;  %v2258_v1 = vpack.c.bf16 %v1234_v0, %v1233_v63  ;;  %v1236_v3 = vld [vmem:[%s2763_s8 + $0x18] sm:$0xff] }
  0xf3   : > { %v525_v34 = vadd.f32 %v1821_v14, %v524_v33  ;;  %v820_v14 = vunpack.c.0.s8 %v812_v9  ;;  %v817_v33 = vsel %vm809_vm14, 16843009, %v2387_v48  ;;  %2243 = vmatprep.subr.bf16.mxu1 %v2242_v2  ;;  %v639_v6 = vadd.f32 %v2523_v37, %v638_v5 }
  0xf4   : > { %2221 = vmatpush3.bf16.xpose.msk.msra.mxu0 %vm2492_vm2, %v2216_v25  ;;  %v825_v43 = vunpack.c.0.s8 %v817_v33  ;;  %2245 = vmatpush3.bf16.msra.mxu1 %v2242_v2  ;;  %v1235_v2 = vld [vmem:[%s2763_s8 + $0x10] sm:$0xff] }
  0xf5   : > { %2224 = vmatprep.subr.msk.bf16.mxu0 %vm2492_vm2, %v2222_v30  ;;  %v2228_v35 = vpack.c.bf16 %v530_v32, %v525_v34  ;;  %vm2544_vm13 = vcmp.ne.s32.totalorder %v820_v14, 0  ;;  %v2246_v7 = vpack.c.bf16 %v644_v4, %v639_v6  ;;  %v2262_v4 = vpack.c.bf16 %v1236_v3, %v1235_v2 }
  0xf6   : > { %vm2582_vm6 = vcmp.ne.s32.totalorder %v825_v43, 0 }
  0xf7   : > { %2247 = vmatprep.subr.bf16.mxu1 %v2246_v7 }
  0xf8   : > { %2249 = vmatpush3.bf16.msra.mxu1 %v2246_v7 }
  0xfc   : > { %2227 = vmatpush3.bf16.xpose.msk.msra.mxu0 %vm2492_vm2, %v2222_v30 }
  0xfd   : > { %2230 = vmatprep.subr.msk.bf16.mxu0 %vm2492_vm2, %v2228_v35 }
 0x104   : > { %2233 = vmatpush3.bf16.xpose.msk.msra.mxu0 %vm2492_vm2, %v2228_v35 }
 0x105   : > { %2259 = vmatprep.subr.bf16.mxu0 %v2258_v1 }
 0x10b   : > { %2067 = vmatmul.mubr.msk.f32.vlgmr.msra.gmra.mrb[8].mxu0 %vm647_vm1, %v500_v16  ;;  %v814_v16 = vsel %vm806_vm8, 16843009, %v2387_v48 }
 0x10c   : > { %2069 = vmatprep.mubr.msk.f32.mxu0 %vm647_vm1, %v505_v24  ;;  %v822_v25 = vunpack.c.0.s8 %v814_v16  ;;  %2261 = vmatpush3.bf16.msra.mxu0 %v2258_v1 }
 0x10d   : > { %2263 = vmatprep.subr.bf16.mxu0 %v2262_v4 }
 0x10e   : > { %vm2559_vm3 = vcmp.ne.s32.totalorder %v822_v25, 0 }
 0x10f   : > { %2070 = vmatmul.mubr.msk.f32.gmra.mrb[10].mxu0 %vm647_vm1, %v510_v22  ;;  %v815_v22 = vsel %vm807_vm9, 16843009, %v2387_v48 }
 0x110   : > { %2072 = vmatprep.mubr.msk.f32.mxu0 %vm647_vm1, %v515_v29  ;;  %v823_v30 = vunpack.c.0.s8 %v815_v22  ;;  %2265 = vmatpush3.bf16.msra.mxu0 %v2262_v4 }
 0x112   : > { %vm2568_vm4 = vcmp.ne.s32.totalorder %v823_v30, 0 }
 0x113   : > { %2073 = vmatmul.mubr.msk.f32.gmra.mrb[12].mxu0 %vm647_vm1, %v520_v27  ;;  %v816_v27 = vsel %vm808_vm11, 16843009, %v2387_v48  ;;  %v826_v48 = vunpack.c.0.s8 %v818_v39 }
 0x114   : > { %2075 = vmatprep.mubr.msk.f32.mxu0 %vm647_vm1, %v525_v34  ;;  %v824_v36 = vunpack.c.0.s8 %v816_v27 }
 0x115   : > { %vm2588_vm7 = vcmp.ne.s32.totalorder %v826_v48, 0 }
 0x116   : > { %vm2574_vm5 = vcmp.ne.s32.totalorder %v824_v36, 0 }
 0x117   : > { %2076 = vmatmul.mubr.msk.f32.gmra.mrb[14].mxu0 %vm647_vm1, %v530_v32 }
 0x1de   : > { %v2068_v21 = vpop.f32.mrb[8].mxu0 }
 0x1df   : > { %v738_v24 = vpop.f32.mrb[9].mxu0  ;;  %v836_v31 = vsel %vm2544_vm13, %v2068_v21, -1e+30 }
 0x1e0   : > { %v835_v26 = vsel %vm2539_vm10, %v738_v24, -1e+30  ;;  %v847_v40 = vsel %vm843_vm12, %v836_v31, -inf }
 0x1e1   : > { %v844_v28 = vsel %vm843_vm12, %v835_v26, -inf }
 0x1e2   : > { %845 = vmax.xlane.f32.xlu0 %v844_v28  ;;  %v2071_v32 = vpop.f32.mrb[10].mxu0 }
 0x1e3   : > { %v748_v35 = vpop.f32.mrb[11].mxu0  ;;  %v838_v44 = vsel %vm2559_vm3, %v2071_v32, -1e+30 }
 0x1e4   : > { %v837_v38 = vsel %vm2552_vm15, %v748_v35, -1e+30  ;;  %v853_v50 = vsel %vm843_vm12, %v838_v44, -inf }
 0x1e5   : > { %v850_v41 = vsel %vm843_vm12, %v837_v38, -inf }
 0x1e6   : > { %848 = vmax.xlane.f32.xlu0 %v847_v40  ;;  %851 = vmax.xlane.f32.xlu1 %v850_v41  ;;  %v2074_v45 = vpop.f32.mrb[12].mxu0 }
 0x1e7   : > { %v758_v47 = vpop.f32.mrb[13].mxu0  ;;  %v840_v53 = vsel %vm2574_vm5, %v2074_v45, -1e+30 }
 0x1e8   : > { %v839_v49 = vsel %vm2568_vm4, %v758_v47, -1e+30  ;;  %v859_v58 = vsel %vm843_vm12, %v840_v53, -inf }
 0x1e9   : > { %v856_v51 = vsel %vm843_vm12, %v839_v49, -inf }
 0x1ea   : > { %854 = vmax.xlane.f32.xlu1 %v853_v50  ;;  %857 = vmax.xlane.f32.xlu0 %v856_v51  ;;  %v2077_v54 = vpop.f32.mrb[14].mxu0 }
 0x1eb   : > { %v768_v56 = vpop.f32.mrb[15].mxu0  ;;  %v842_v60 = vsel %vm2588_vm7, %v2077_v54, -1e+30 }
 0x1ec   : > { %v841_v57 = vsel %vm2582_vm6, %v768_v56, -1e+30  ;;  %v865_v61 = vsel %vm843_vm12, %v842_v60, -inf }
 0x1ed   : > { %v862_v59 = vsel %vm843_vm12, %v841_v57, -inf }
 0x1ee   : > { %860 = vmax.xlane.f32.xlu1 %v859_v58  ;;  %863 = vmax.xlane.f32.xlu0 %v862_v59  ;;  %v1094_v58 = vld [vmem:[%s2761_s6 + $0x8] sm:$0xff]  ;;  %v1095_v59 = vld [vmem:[%s2761_s6 + $0x10] sm:$0xff] }
 0x1f2   : > { %866 = vmax.xlane.f32.xlu1 %v865_v61  ;;  %v1096_v61 = vld [vmem:[%s2761_s6 + $0x18] sm:$0xff] }
 0x1f3   : > { %v2254_v62 = vpack.c.bf16 %v1096_v61, %v1095_v59 }
 0x26f   : > { %v846_v8 = vpop.xlane.xlu0 %845 }
 0x270   : > { %v868_v9 = vsub.f32 %v835_v26, %v846_v8 }
 0x272   : > { %v876_v10 = vmul.f32 1.442695, %v868_v9 }
 0x273   : > { %v849_v11 = vpop.xlane.xlu0 %848  ;;  %v852_v12 = vpop.xlane.xlu1 %851 }
 0x274   : > { %2315 = vpow2.f32 %v876_v10  ;;  %v869_v13 = vsub.f32 %v836_v31, %v849_v11  ;;  %v870_v14 = vsub.f32 %v837_v38, %v852_v12 }
 0x276   : > { %v878_v15 = vmul.f32 1.442695, %v869_v13  ;;  %v880_v16 = vmul.f32 1.442695, %v870_v14 }
 0x277   : > { %v855_v18 = vpop.xlane.xlu1 %854  ;;  %v858_v20 = vpop.xlane.xlu0 %857 }
 0x278   : > { %2317 = vpow2.f32 %v878_v15  ;;  %v871_v21 = vsub.f32 %v838_v44, %v855_v18  ;;  %v872_v22 = vsub.f32 %v839_v49, %v858_v20 }
 0x279   : > { %2319 = vpow2.f32 %v880_v16 }
 0x27a   : > { %v882_v37 = vmul.f32 1.442695, %v871_v21  ;;  %v884_v24 = vmul.f32 1.442695, %v872_v22 }
 0x27b   : > { %v861_v25 = vpop.xlane.xlu1 %860  ;;  %v864_v27 = vpop.xlane.xlu0 %863 }
 0x27c   : > { %2321 = vpow2.f32 %v882_v37  ;;  %v873_v26 = vsub.f32 %v840_v53, %v861_v25  ;;  %v874_v28 = vsub.f32 %v841_v57, %v864_v27  ;;  %v1093_v57 = vld [vmem:[%s2761_s6] sm:$0xff] }
 0x27d   : > { %2323 = vpow2.f32 %v884_v24 }
 0x27e   : > { %v2316_v30 = vpop.eup %2315  ;;  %v886_v32 = vmul.f32 1.442695, %v873_v26  ;;  %v888_v31 = vmul.f32 1.442695, %v874_v28 }
 0x27f   : > { %2094 = vmatprep.mubr.msk.f32.mxu1 %vm843_vm12, %v2316_v30  ;;  %v867_v33 = vpop.xlane.xlu1 %866  ;;  %v892_v35 = vsel %vm843_vm12, %v2316_v30, 0.0 }
 0x280   : > { %2325 = vpow2.f32 %v886_v32  ;;  %v875_v36 = vsub.f32 %v842_v60, %v867_v33  ;;  %893 = vadd.xlane.f32.xlu0 %v892_v35  ;;  %v2250_v60 = vpack.c.bf16 %v1094_v58, %v1093_v57 }
 0x281   : > { %2327 = vpow2.f32 %v888_v31 }
 0x282   : > { %v2318_v38 = vpop.eup %2317  ;;  %v890_v39 = vmul.f32 1.442695, %v875_v36  ;;  %2251 = vmatprep.subr.bf16.mxu1 %v2250_v60 }
 0x283   : > { %v2320_v40 = vpop.eup %2319  ;;  %2095 = vmatmul.mubr.msk.f32.vlgmr.msra.gmra.mrb[8].mxu1 %vm843_vm12, %v2318_v38  ;;  %v895_v41 = vsel %vm843_vm12, %v2318_v38, 0.0 }
 0x284   : > { %2329 = vpow2.f32 %v890_v39  ;;  %2097 = vmatprep.mubr.msk.f32.mxu1 %vm843_vm12, %v2320_v40  ;;  %896 = vadd.xlane.f32.xlu1 %v895_v41  ;;  %v898_v43 = vsel %vm843_vm12, %v2320_v40, 0.0 }
 0x285   : > { %899 = vadd.xlane.f32.xlu0 %v898_v43  ;;  %2253 = vmatpush3.bf16.msra.mxu1 %v2250_v60 }
 0x286   : > { %v2322_v44 = vpop.eup %2321  ;;  %2255 = vmatprep.subr.bf16.mxu1 %v2254_v62 }
 0x287   : > { %v2324_v45 = vpop.eup %2323  ;;  %2098 = vmatmul.mubr.msk.f32.gmra.mrb[10].mxu1 %vm843_vm12, %v2322_v44  ;;  %v901_v47 = vsel %vm843_vm12, %v2322_v44, 0.0 }
 0x288   : > { %2100 = vmatprep.mubr.msk.f32.mxu1 %vm843_vm12, %v2324_v45  ;;  %902 = vadd.xlane.f32.xlu1 %v901_v47  ;;  %v904_v48 = vsel %vm843_vm12, %v2324_v45, 0.0 }
 0x289   : > { %905 = vadd.xlane.f32.xlu0 %v904_v48  ;;  %2257 = vmatpush3.bf16.msra.mxu1 %v2254_v62 }
 0x28a   : > { %v2326_v49 = vpop.eup %2325 }
 0x28b   : > { %v2328_v50 = vpop.eup %2327  ;;  %2101 = vmatmul.mubr.msk.f32.gmra.mrb[12].mxu1 %vm843_vm12, %v2326_v49  ;;  %v907_v51 = vsel %vm843_vm12, %v2326_v49, 0.0 }
 0x28c   : > { %908 = vadd.xlane.f32.xlu1 %v907_v51  ;;  %2103 = vmatprep.mubr.msk.f32.mxu1 %vm843_vm12, %v2328_v50  ;;  %v910_v53 = vsel %vm843_vm12, %v2328_v50, 0.0 }
 0x28d   : > { %911 = vadd.xlane.f32.xlu0 %v910_v53 }
 0x28e   : > { %v2330_v54 = vpop.eup %2329 }
 0x28f   : > { %2104 = vmatmul.mubr.msk.f32.gmra.mrb[14].mxu1 %vm843_vm12, %v2330_v54  ;;  %v913_v56 = vsel %vm843_vm12, %v2330_v54, 0.0 }
 0x290   : > { %914 = vadd.xlane.f32.xlu1 %v913_v56 }
 0x30d   : > { %v894_v6 = vpop.xlane.xlu0 %893 }
 0x30e   : > { %v1045_v10 = vmax.f32 %v894_v6, 1e-30  ;;  %v1863_v6 = vld [vmem:[%s2762_s7] ss:$0 sm:$0xff] }
 0x311   : > { %v897_v5 = vpop.xlane.xlu1 %896 }
 0x312   : > { %v900_v8 = vpop.xlane.xlu0 %899  ;;  %v1046_v9 = vmax.f32 %v897_v5, 1e-30 }
 0x313   : > { %v1047_v14 = vmax.f32 %v900_v8, 1e-30 }
 0x314   : > { %2331 = vrcp.f32 %v1046_v9 }
 0x315   : > { %v903_v7 = vpop.xlane.xlu1 %902  ;;  %2333 = vrcp.f32 %v1045_v10 }
 0x316   : > { %v1048_v12 = vmax.f32 %v903_v7, 1e-30  ;;  %v906_v13 = vpop.xlane.xlu0 %905  ;;  %v1872_v7 = vld [vmem:[%s2764_s9] ss:$0 sm:$0xff] }
 0x317   : > { %v1049_v16 = vmax.f32 %v906_v13, 1e-30 }
 0x318   : > { %2335 = vrcp.f32 %v1048_v12 }
 0x319   : > { %v909_v11 = vpop.xlane.xlu1 %908  ;;  %2337 = vrcp.f32 %v1047_v14 }
 0x31a   : > { %v1050_v15 = vmax.f32 %v909_v11, 1e-30  ;;  %v912_v20 = vpop.xlane.xlu0 %911 }
 0x31b   : > { %v1051_v22 = vmax.f32 %v912_v20, 1e-30 }
 0x31c   : > { %2339 = vrcp.f32 %v1050_v15 }
 0x31d   : > { %v915_v18 = vpop.xlane.xlu1 %914  ;;  %2341 = vrcp.f32 %v1049_v16 }
 0x31e   : > { %v1052_v21 = vmax.f32 %v915_v18, 1e-30  ;;  %v2332_v37 = vpop.eup %2331 }
 0x31f   : > { %v2334_v25 = vpop.eup %2333 }
 0x320   : > { %2343 = vrcp.f32 %v1052_v21 }
 0x321   : > { %2345 = vrcp.f32 %v1051_v22 }
 0x322   : > { %v2336_v32 = vpop.eup %2335 }
 0x323   : > { %v2338_v35 = vpop.eup %2337 }
 0x326   : > { %v2340_v44 = vpop.eup %2339 }
 0x327   : > { %v2342_v48 = vpop.eup %2341 }
 0x32a   : > { %v2344_v57 = vpop.eup %2343 }
 0x32b   : > { %v2346_v60 = vpop.eup %2345 }
 0x356   : > { %v2096_v24 = vpop.f32.mrb[8].mxu1 }
 0x357   : > { %v1062_v27 = vmul.f32 %v2332_v37, %v2096_v24  ;;  %v1006_v26 = vpop.f32.mrb[9].mxu1 }
 0x358   : > { %v1061_v28 = vmul.f32 %v2334_v25, %v1006_v26 }
 0x359   : > { %v1078_v30 = vmul.f32 0.2, %v1062_v27  ;;  %vm1070_vm8 = vcmp.gt.f32.partialorder %v1062_v27, 0.0 }
 0x35a   : > { %vm1069_vm9 = vcmp.gt.f32.partialorder %v1061_v28, 0.0  ;;  %v1077_v31 = vmul.f32 0.2, %v1061_v28  ;;  %v2099_v33 = vpop.f32.mrb[10].mxu1 }
 0x35b   : > { %v1064_v36 = vmul.f32 %v2336_v32, %v2099_v33  ;;  %v1016_v38 = vpop.f32.mrb[11].mxu1  ;;  %v1086_v41 = vsel %vm1070_vm8, %v1062_v27, %v1078_v30 }
 0x35c   : > { %v1063_v39 = vmul.f32 %v2338_v35, %v1016_v38  ;;  %v1085_v40 = vsel %vm1069_vm9, %v1061_v28, %v1077_v31 }
 0x35d   : > { %v1080_v43 = vmul.f32 0.2, %v1064_v36  ;;  %2114 = vmatprep.mubr.msk.f32.mxu1 %vm647_vm1, %v1085_v40  ;;  %2134 = vmatprep.mubr.msk.f32.mxu0 %vm647_vm1, %v1085_v40  ;;  %vm1072_vm11 = vcmp.gt.f32.partialorder %v1064_v36, 0.0 }
 0x35e   : > { %vm1071_vm14 = vcmp.gt.f32.partialorder %v1063_v39, 0.0  ;;  %v1079_v45 = vmul.f32 0.2, %v1063_v39  ;;  %v2102_v47 = vpop.f32.mrb[12].mxu1  ;;  %2115 = vmatmul.mubr.msk.f32.vlgmr.msra.gmra.mrb[16].mxu1 %vm647_vm1, %v1086_v41  ;;  %2135 = vmatmul.mubr.msk.f32.vlgmr.msra.gmra.mrb[16].mxu0 %vm647_vm1, %v1086_v41 }
 0x35f   : > { %v1066_v49 = vmul.f32 %v2340_v44, %v2102_v47  ;;  %v1026_v50 = vpop.f32.mrb[13].mxu1  ;;  %v1088_v56 = vsel %vm1072_vm11, %v1064_v36, %v1080_v43 }
 0x360   : > { %v1065_v51 = vmul.f32 %v2342_v48, %v1026_v50  ;;  %v1087_v53 = vsel %vm1071_vm14, %v1063_v39, %v1079_v45 }
 0x361   : > { %v1082_v54 = vmul.f32 0.2, %v1066_v49  ;;  %2117 = vmatprep.mubr.msk.f32.mxu1 %vm647_vm1, %v1087_v53  ;;  %2137 = vmatprep.mubr.msk.f32.mxu0 %vm647_vm1, %v1087_v53  ;;  %vm1074_vm0 = vcmp.gt.f32.partialorder %v1066_v49, 0.0 }
 0x362   : > { %vm1073_vm8 = vcmp.gt.f32.partialorder %v1065_v51, 0.0  ;;  %v1081_v58 = vmul.f32 0.2, %v1065_v51  ;;  %v2105_v59 = vpop.f32.mrb[14].mxu1  ;;  %2118 = vmatmul.mubr.msk.f32.gmra.mrb[18].mxu1 %vm647_vm1, %v1088_v56  ;;  %2138 = vmatmul.mubr.msk.f32.gmra.mrb[18].mxu0 %vm647_vm1, %v1088_v56 }
 0x363   : > { %v1068_v61 = vmul.f32 %v2344_v57, %v2105_v59  ;;  %v1036_v62 = vpop.f32.mrb[15].mxu1  ;;  %v1090_v2 = vsel %vm1074_vm0, %v1066_v49, %v1082_v54 }
 0x364   : > { %v1067_v63 = vmul.f32 %v2346_v60, %v1036_v62  ;;  %v1089_v0 = vsel %vm1073_vm8, %v1065_v51, %v1081_v58 }
 0x365   : > { %v1084_v1 = vmul.f32 0.2, %v1068_v61  ;;  %2120 = vmatprep.mubr.msk.f32.mxu1 %vm647_vm1, %v1089_v0  ;;  %2140 = vmatprep.mubr.msk.f32.mxu0 %vm647_vm1, %v1089_v0  ;;  %vm1076_vm9 = vcmp.gt.f32.partialorder %v1068_v61, 0.0 }
 0x366   : > { %vm1075_vm11 = vcmp.gt.f32.partialorder %v1067_v63, 0.0  ;;  %v1083_v3 = vmul.f32 0.2, %v1067_v63  ;;  %2121 = vmatmul.mubr.msk.f32.gmra.mrb[20].mxu1 %vm647_vm1, %v1090_v2  ;;  %2141 = vmatmul.mubr.msk.f32.gmra.mrb[20].mxu0 %vm647_vm1, %v1090_v2 }
 0x367   : > { %v1092_v5 = vsel %vm1076_vm9, %v1068_v61, %v1084_v1 }
 0x368   : > { %v1091_v4 = vsel %vm1075_vm11, %v1067_v63, %v1083_v3 }
 0x369   : > { %2123 = vmatprep.mubr.msk.f32.mxu1 %vm647_vm1, %v1091_v4  ;;  %2143 = vmatprep.mubr.msk.f32.mxu0 %vm647_vm1, %v1091_v4 }
 0x36a   : > { %2124 = vmatmul.mubr.msk.f32.gmra.mrb[22].mxu1 %vm647_vm1, %v1092_v5  ;;  %2144 = vmatmul.mubr.msk.f32.gmra.mrb[22].mxu0 %vm647_vm1, %v1092_v5 }
 0x431   : > { %v2116_v8 = vpop.f32.mrb[16].mxu1  ;;  %v2136_v9 = vpop.f32.mrb[16].mxu0 }
 0x432   : > { %v1200_v10 = vadd.f32 %v2116_v8, %v1863_v6  ;;  %v1316_v11 = vadd.f32 %v2136_v9, %v1872_v7  ;;  %v1194_v12 = vpop.f32.mrb[17].mxu1  ;;  %v1310_v13 = vpop.f32.mrb[17].mxu0 }
 0x433   : > { %v1195_v14 = vadd.f32 %v1863_v6, %v1194_v12  ;;  %v1311_v15 = vadd.f32 %v1872_v7, %v1310_v13 }
 0x435   : > { %v2266_v16 = vpack.c.bf16 %v1200_v10, %v1195_v14  ;;  %v2290_v18 = vpack.c.bf16 %v1316_v11, %v1311_v15  ;;  %v2119_v20 = vpop.f32.mrb[18].mxu1  ;;  %v2139_v21 = vpop.f32.mrb[18].mxu0  ;;  %2162 = vmatprep.mubr.msk.f32.mxu1 %vm647_vm1, %v1195_v14 }
 0x436   : > { %v1210_v22 = vadd.f32 %v2119_v20, %v1863_v6  ;;  %v1326_v37 = vadd.f32 %v2139_v21, %v1872_v7  ;;  %v1204_v24 = vpop.f32.mrb[19].mxu1  ;;  %v1320_v25 = vpop.f32.mrb[19].mxu0 }
 0x437   : > { %v1205_v27 = vadd.f32 %v1863_v6, %v1204_v24  ;;  %v1321_v26 = vadd.f32 %v1872_v7, %v1320_v25  ;;  %2268 = vmatprep.subr.msk.bf16.mxu1 %vm2492_vm2, %v2266_v16  ;;  %2291 = vmatprep.subr.bf16.mxu0 %v2290_v18 }
 0x438   : > { %2271 = vmatpush3.bf16.xpose.msk.msra.mxu1 %vm2492_vm2, %v2266_v16  ;;  %2293 = vmatpush3.bf16.msra.mxu0 %v2290_v18 }
 0x439   : > { %v2272_v28 = vpack.c.bf16 %v1210_v22, %v1205_v27  ;;  %v2294_v30 = vpack.c.bf16 %v1326_v37, %v1321_v26  ;;  %v2122_v32 = vpop.f32.mrb[20].mxu1  ;;  %v2142_v31 = vpop.f32.mrb[20].mxu0 }
 0x43a   : > { %v1220_v33 = vadd.f32 %v2122_v32, %v1863_v6  ;;  %v1336_v35 = vadd.f32 %v2142_v31, %v1872_v7  ;;  %v1214_v36 = vpop.f32.mrb[21].mxu1  ;;  %v1330_v38 = vpop.f32.mrb[21].mxu0 }
 0x43b   : > { %v1215_v39 = vadd.f32 %v1863_v6, %v1214_v36  ;;  %v1331_v40 = vadd.f32 %v1872_v7, %v1330_v38  ;;  %2274 = vmatprep.subr.msk.bf16.mxu1 %vm2492_vm2, %v2272_v28  ;;  %2295 = vmatprep.subr.bf16.mxu0 %v2294_v30 }
 0x43c   : > { %2297 = vmatpush3.bf16.msra.mxu0 %v2294_v30 }
 0x43d   : > { %v2278_v41 = vpack.c.bf16 %v1220_v33, %v1215_v39  ;;  %v2298_v43 = vpack.c.bf16 %v1336_v35, %v1331_v40  ;;  %v2125_v44 = vpop.f32.mrb[22].mxu1  ;;  %v2145_v45 = vpop.f32.mrb[22].mxu0 }
 0x43e   : > { %v1230_v47 = vadd.f32 %v2125_v44, %v1863_v6  ;;  %v1346_v48 = vadd.f32 %v2145_v45, %v1872_v7  ;;  %v1224_v49 = vpop.f32.mrb[23].mxu1  ;;  %v1340_v50 = vpop.f32.mrb[23].mxu0 }
 0x43f   : > { %v1225_v51 = vadd.f32 %v1863_v6, %v1224_v49  ;;  %v1341_v53 = vadd.f32 %v1872_v7, %v1340_v50  ;;  %2299 = vmatprep.subr.bf16.mxu0 %v2298_v43 }
 0x440   : > { %2277 = vmatpush3.bf16.xpose.msk.msra.mxu1 %vm2492_vm2, %v2272_v28  ;;  %2301 = vmatpush3.bf16.msra.mxu0 %v2298_v43 }
 0x441   : > { %v2284_v54 = vpack.c.bf16 %v1230_v47, %v1225_v51  ;;  %v2302_v56 = vpack.c.bf16 %v1346_v48, %v1341_v53  ;;  %2280 = vmatprep.subr.msk.bf16.mxu1 %vm2492_vm2, %v2278_v41 }
 0x443   : > { %2303 = vmatprep.subr.bf16.mxu0 %v2302_v56 }
 0x444   : > { %2305 = vmatpush3.bf16.msra.mxu0 %v2302_v56 }
 0x448   : > { %2283 = vmatpush3.bf16.xpose.msk.msra.mxu1 %vm2492_vm2, %v2278_v41 }
 0x449   : > { %2286 = vmatprep.subr.msk.bf16.mxu1 %vm2492_vm2, %v2284_v54 }
 0x450   : > { %2289 = vmatpush3.bf16.xpose.msk.msra.mxu1 %vm2492_vm2, %v2284_v54 }
 0x457   : > { %2163 = vmatmul.mubr.msk.f32.vlgmr.msra.gmra.mrb[24].mxu1 %vm647_vm1, %v1200_v10 }
 0x458   : > { %2165 = vmatprep.mubr.msk.f32.mxu1 %vm647_vm1, %v1205_v27 }
 0x45b   : > { %2166 = vmatmul.mubr.msk.f32.gmra.mrb[26].mxu1 %vm647_vm1, %v1210_v22 }
 0x45c   : > { %2168 = vmatprep.mubr.msk.f32.mxu1 %vm647_vm1, %v1215_v39 }
 0x45f   : > { %2169 = vmatmul.mubr.msk.f32.gmra.mrb[28].mxu1 %vm647_vm1, %v1220_v33 }
 0x460   : > { %2171 = vmatprep.mubr.msk.f32.mxu1 %vm647_vm1, %v1225_v51 }
 0x463   : > { %2172 = vmatmul.mubr.msk.f32.gmra.mrb[30].mxu1 %vm647_vm1, %v1230_v47 }
 0x52a   : > { %v2164_v57 = vpop.f32.mrb[24].mxu1 }
 0x52b   : > { %v1479_v58 = vsel %vm2544_vm13, %v2164_v57, -1e+30  ;;  %v1439_v19 = vpop.f32.mrb[25].mxu1 }
 0x52c   : > { %v1478_v59 = vsel %vm2539_vm10, %v1439_v19, -1e+30  ;;  %v1489_v60 = vsel %vm843_vm12, %v1479_v58, -inf }
 0x52d   : > { %1490 = vmax.xlane.f32.xlu1 %v1489_v60  ;;  %v1486_v61 = vsel %vm843_vm12, %v1478_v59, -inf }
 0x52e   : > { %1487 = vmax.xlane.f32.xlu0 %v1486_v61  ;;  %v2167_v62 = vpop.f32.mrb[26].mxu1 }
 0x52f   : > { %v1481_v63 = vsel %vm2559_vm3, %v2167_v62, -1e+30  ;;  %v1449_v0 = vpop.f32.mrb[27].mxu1 }
 0x530   : > { %v1480_v1 = vsel %vm2552_vm15, %v1449_v0, -1e+30  ;;  %v1495_v23 = vsel %vm843_vm12, %v1481_v63, -inf }
 0x531   : > { %1496 = vmax.xlane.f32.xlu1 %v1495_v23  ;;  %v1492_v17 = vsel %vm843_vm12, %v1480_v1, -inf }
 0x532   : > { %1493 = vmax.xlane.f32.xlu0 %v1492_v17  ;;  %v2170_v2 = vpop.f32.mrb[28].mxu1 }
 0x533   : > { %v1483_v3 = vsel %vm2574_vm5, %v2170_v2, -1e+30  ;;  %v1459_v4 = vpop.f32.mrb[29].mxu1 }
 0x534   : > { %v1482_v5 = vsel %vm2568_vm4, %v1459_v4, -1e+30  ;;  %v1501_v34 = vsel %vm843_vm12, %v1483_v3, -inf }
 0x535   : > { %1502 = vmax.xlane.f32.xlu1 %v1501_v34  ;;  %v1498_v29 = vsel %vm843_vm12, %v1482_v5, -inf }
 0x536   : > { %1499 = vmax.xlane.f32.xlu0 %v1498_v29  ;;  %v2173_v6 = vpop.f32.mrb[30].mxu1 }
 0x537   : > { %v1485_v7 = vsel %vm2588_vm7, %v2173_v6, -1e+30  ;;  %v1469_v8 = vpop.f32.mrb[31].mxu1 }
 0x538   : > { %v1484_v9 = vsel %vm2582_vm6, %v1469_v8, -1e+30  ;;  %v1507_v46 = vsel %vm843_vm12, %v1485_v7, -inf }
 0x539   : > { %1508 = vmax.xlane.f32.xlu1 %v1507_v46  ;;  %v1504_v42 = vsel %vm843_vm12, %v1484_v9, -inf }
 0x53a   : > { %1505 = vmax.xlane.f32.xlu0 %v1504_v42 }
 0x5ba   : > { %v1491_v10 = vpop.xlane.xlu1 %1490 }
 0x5bb   : > { %v1511_v11 = vsub.f32 %v1479_v58, %v1491_v10  ;;  %v1488_v12 = vpop.xlane.xlu0 %1487 }
 0x5bc   : > { %v1510_v13 = vsub.f32 %v1478_v59, %v1488_v12 }
 0x5bd   : > { %v1520_v14 = vmul.f32 1.442695, %v1511_v11 }
 0x5be   : > { %v1518_v15 = vmul.f32 1.442695, %v1510_v13  ;;  %v1497_v16 = vpop.xlane.xlu1 %1496 }
 0x5bf   : > { %2347 = vpow2.f32 %v1520_v14  ;;  %v1513_v55 = vsub.f32 %v1481_v63, %v1497_v16  ;;  %v1494_v18 = vpop.xlane.xlu0 %1493 }
 0x5c0   : > { %2349 = vpow2.f32 %v1518_v15  ;;  %v1512_v20 = vsub.f32 %v1480_v1, %v1494_v18 }
 0x5c1   : > { %v1524_v52 = vmul.f32 1.442695, %v1513_v55 }
 0x5c2   : > { %v1522_v21 = vmul.f32 1.442695, %v1512_v20  ;;  %v1503_v22 = vpop.xlane.xlu1 %1502 }
 0x5c3   : > { %2351 = vpow2.f32 %v1524_v52  ;;  %v1515_v37 = vsub.f32 %v1483_v3, %v1503_v22  ;;  %v1500_v24 = vpop.xlane.xlu0 %1499 }
 0x5c4   : > { %2353 = vpow2.f32 %v1522_v21  ;;  %v1514_v25 = vsub.f32 %v1482_v5, %v1500_v24 }
 0x5c5   : > { %v1528_v27 = vmul.f32 1.442695, %v1515_v37 }
 0x5c6   : > { %v1526_v26 = vmul.f32 1.442695, %v1514_v25  ;;  %v1509_v28 = vpop.xlane.xlu1 %1508 }
 0x5c7   : > { %2355 = vpow2.f32 %v1528_v27  ;;  %v1517_v30 = vsub.f32 %v1485_v7, %v1509_v28  ;;  %v1506_v32 = vpop.xlane.xlu0 %1505 }
 0x5c8   : > { %2357 = vpow2.f32 %v1526_v26  ;;  %v1516_v31 = vsub.f32 %v1484_v9, %v1506_v32 }
 0x5c9   : > { %v2348_v33 = vpop.eup %2347  ;;  %v1532_v35 = vmul.f32 1.442695, %v1517_v30 }
 0x5ca   : > { %v2350_v36 = vpop.eup %2349  ;;  %v1530_v38 = vmul.f32 1.442695, %v1516_v31  ;;  %v1537_v39 = vsel %vm843_vm12, %v2348_v33, 0.0 }
 0x5cb   : > { %2359 = vpow2.f32 %v1532_v35  ;;  %2190 = vmatprep.mubr.msk.f32.mxu0 %vm843_vm12, %v2350_v36  ;;  %1538 = vadd.xlane.f32.xlu1 %v1537_v39  ;;  %v1534_v40 = vsel %vm843_vm12, %v2350_v36, 0.0 }
 0x5cc   : > { %2361 = vpow2.f32 %v1530_v38  ;;  %2191 = vmatmul.mubr.msk.f32.vlgmr.msra.gmra.mrb[24].mxu0 %vm843_vm12, %v2348_v33  ;;  %1535 = vadd.xlane.f32.xlu0 %v1534_v40 }
 0x5cd   : > { %v2352_v41 = vpop.eup %2351 }
 0x5ce   : > { %v2354_v43 = vpop.eup %2353  ;;  %v1543_v44 = vsel %vm843_vm12, %v2352_v41, 0.0 }
 0x5cf   : > { %2193 = vmatprep.mubr.msk.f32.mxu0 %vm843_vm12, %v2354_v43  ;;  %1544 = vadd.xlane.f32.xlu1 %v1543_v44  ;;  %v1540_v45 = vsel %vm843_vm12, %v2354_v43, 0.0 }
 0x5d0   : > { %2194 = vmatmul.mubr.msk.f32.gmra.mrb[26].mxu0 %vm843_vm12, %v2352_v41  ;;  %1541 = vadd.xlane.f32.xlu0 %v1540_v45 }
 0x5d1   : > { %v2356_v47 = vpop.eup %2355 }
 0x5d2   : > { %v2358_v48 = vpop.eup %2357  ;;  %v1549_v49 = vsel %vm843_vm12, %v2356_v47, 0.0 }
 0x5d3   : > { %2196 = vmatprep.mubr.msk.f32.mxu0 %vm843_vm12, %v2358_v48  ;;  %1550 = vadd.xlane.f32.xlu1 %v1549_v49  ;;  %v1546_v50 = vsel %vm843_vm12, %v2358_v48, 0.0 }
 0x5d4   : > { %2197 = vmatmul.mubr.msk.f32.gmra.mrb[28].mxu0 %vm843_vm12, %v2356_v47  ;;  %1547 = vadd.xlane.f32.xlu0 %v1546_v50 }
 0x5d5   : > { %v2360_v51 = vpop.eup %2359 }
 0x5d6   : > { %v2362_v53 = vpop.eup %2361  ;;  %v1555_v54 = vsel %vm843_vm12, %v2360_v51, 0.0 }
 0x5d7   : > { %1556 = vadd.xlane.f32.xlu1 %v1555_v54  ;;  %2199 = vmatprep.mubr.msk.f32.mxu0 %vm843_vm12, %v2362_v53  ;;  %v1552_v56 = vsel %vm843_vm12, %v2362_v53, 0.0 }
 0x5d8   : > { %2200 = vmatmul.mubr.msk.f32.gmra.mrb[30].mxu0 %vm843_vm12, %v2360_v51  ;;  %1553 = vadd.xlane.f32.xlu0 %v1552_v56 }
 0x658   : > { %v1539_v57 = vpop.xlane.xlu1 %1538 }
 0x659   : > { %v1536_v58 = vpop.xlane.xlu0 %1535  ;;  %v1688_v60 = vmax.f32 %v1539_v57, 1e-30 }
 0x65a   : > { %v1687_v61 = vmax.f32 %v1536_v58, 1e-30 }
 0x65b   : > { %2363 = vrcp.f32 %v1688_v60 }
 0x65c   : > { %v1545_v19 = vpop.xlane.xlu1 %1544  ;;  %2365 = vrcp.f32 %v1687_v61 }
 0x65d   : > { %v1542_v59 = vpop.xlane.xlu0 %1541  ;;  %v1690_v63 = vmax.f32 %v1545_v19, 1e-30 }
 0x65e   : > { %v1689_v1 = vmax.f32 %v1542_v59, 1e-30 }
 0x65f   : > { %2367 = vrcp.f32 %v1690_v63 }
 0x660   : > { %v1551_v62 = vpop.xlane.xlu1 %1550  ;;  %2369 = vrcp.f32 %v1689_v1 }
 0x661   : > { %v1548_v0 = vpop.xlane.xlu0 %1547  ;;  %v1692_v23 = vmax.f32 %v1551_v62, 1e-30 }
 0x662   : > { %v1691_v17 = vmax.f32 %v1548_v0, 1e-30 }
 0x663   : > { %2371 = vrcp.f32 %v1692_v23 }
 0x664   : > { %v1557_v2 = vpop.xlane.xlu1 %1556  ;;  %2373 = vrcp.f32 %v1691_v17 }
 0x665   : > { %v1554_v3 = vpop.xlane.xlu0 %1553  ;;  %v1694_v4 = vmax.f32 %v1557_v2, 1e-30  ;;  %v2364_v34 = vpop.eup %2363 }
 0x666   : > { %v1693_v5 = vmax.f32 %v1554_v3, 1e-30  ;;  %v2366_v6 = vpop.eup %2365 }
 0x667   : > { %2375 = vrcp.f32 %v1694_v4 }
 0x668   : > { %2377 = vrcp.f32 %v1693_v5 }
 0x669   : > { %v2368_v42 = vpop.eup %2367 }
 0x66a   : > { %v2370_v12 = vpop.eup %2369 }
 0x66d   : > { %v2372_v20 = vpop.eup %2371 }
 0x66e   : > { %v2374_v22 = vpop.eup %2373 }
 0x671   : > { %v2376_v30 = vpop.eup %2375 }
 0x672   : > { %v2378_v33 = vpop.eup %2377 }
 0x69f   : > { %v2192_v29 = vpop.f32.mrb[24].mxu0 }
 0x6a0   : > { %v1704_v7 = vmul.f32 %v2364_v34, %v2192_v29  ;;  %v1648_v8 = vpop.f32.mrb[25].mxu0 }
 0x6a1   : > { %v1703_v9 = vmul.f32 %v2366_v6, %v1648_v8 }
 0x6a2   : > { %vm1712_vm2 = vcmp.gt.f32.partialorder %v1704_v7, 0.0  ;;  %v1720_v46 = vmul.f32 0.2, %v1704_v7 }
 0x6a3   : > { %vm1711_vm10 = vcmp.gt.f32.partialorder %v1703_v9, 0.0  ;;  %v1719_v10 = vmul.f32 0.2, %v1703_v9  ;;  %v2195_v11 = vpop.f32.mrb[26].mxu0 }
 0x6a4   : > { %v1728_v13 = vsel %vm1712_vm2, %v1704_v7, %v1720_v46  ;;  %v1706_v14 = vmul.f32 %v2368_v42, %v2195_v11  ;;  %v1658_v15 = vpop.f32.mrb[27].mxu0 }
 0x6a5   : > { %1736 = vst.msk [vmem:[%s2734_s23 + $0x8] sm:$0xff] %vm647_vm1, %v1728_v13  ;;  %v1727_v16 = vsel %vm1711_vm10, %v1703_v9, %v1719_v10  ;;  %v1705_v55 = vmul.f32 %v2370_v12, %v1658_v15 }
 0x6a6   : > { %1735 = vst.msk [vmem:[%s2734_s23] sm:$0xff] %vm647_vm1, %v1727_v16  ;;  %vm1714_vm12 = vcmp.gt.f32.partialorder %v1706_v14, 0.0  ;;  %v1722_v18 = vmul.f32 0.2, %v1706_v14 }
 0x6a7   : > { %vm1713_vm13 = vcmp.gt.f32.partialorder %v1705_v55, 0.0  ;;  %v1721_v52 = vmul.f32 0.2, %v1705_v55  ;;  %v2198_v21 = vpop.f32.mrb[28].mxu0 }
 0x6a8   : > { %v1730_v37 = vsel %vm1714_vm12, %v1706_v14, %v1722_v18  ;;  %v1708_v24 = vmul.f32 %v2372_v20, %v2198_v21  ;;  %v1668_v25 = vpop.f32.mrb[29].mxu0 }
 0x6a9   : > { %1738 = vst.msk [vmem:[%s2734_s23 + $0x18] sm:$0xff] %vm647_vm1, %v1730_v37  ;;  %v1729_v27 = vsel %vm1713_vm13, %v1705_v55, %v1721_v52  ;;  %v1707_v26 = vmul.f32 %v2374_v22, %v1668_v25 }
 0x6aa   : > { %1737 = vst.msk [vmem:[%s2734_s23 + $0x10] sm:$0xff] %vm647_vm1, %v1729_v27  ;;  %vm1716_vm15 = vcmp.gt.f32.partialorder %v1708_v24, 0.0  ;;  %v1724_v28 = vmul.f32 0.2, %v1708_v24 }
 0x6ab   : > { %vm1715_vm3 = vcmp.gt.f32.partialorder %v1707_v26, 0.0  ;;  %v1723_v32 = vmul.f32 0.2, %v1707_v26  ;;  %v2201_v31 = vpop.f32.mrb[30].mxu0 }
 0x6ac   : > { %v1732_v35 = vsel %vm1716_vm15, %v1708_v24, %v1724_v28  ;;  %v1710_v36 = vmul.f32 %v2376_v30, %v2201_v31  ;;  %v1678_v38 = vpop.f32.mrb[31].mxu0 }
 0x6ad   : > { %1740 = vst.msk [vmem:[%s2734_s23 + $0x28] sm:$0xff] %vm647_vm1, %v1732_v35  ;;  %v1731_v39 = vsel %vm1715_vm3, %v1707_v26, %v1723_v32  ;;  %v1709_v40 = vmul.f32 %v2378_v33, %v1678_v38 }
 0x6ae   : > { %1739 = vst.msk [vmem:[%s2734_s23 + $0x20] sm:$0xff] %vm647_vm1, %v1731_v39  ;;  %vm1718_vm4 = vcmp.gt.f32.partialorder %v1710_v36, 0.0  ;;  %v1726_v41 = vmul.f32 0.2, %v1710_v36 }
 0x6af   : > { %vm1717_vm5 = vcmp.gt.f32.partialorder %v1709_v40, 0.0  ;;  %v1725_v43 = vmul.f32 0.2, %v1709_v40 }
 0x6b0   : > { %v1734_v44 = vsel %vm1718_vm4, %v1710_v36, %v1726_v41 }
 0x6b1   : > { %1742 = vst.msk [vmem:[%s2734_s23 + $0x38] sm:$0xff] %vm647_vm1, %v1734_v44  ;;  %v1733_v45 = vsel %vm1717_vm5, %v1709_v40, %v1725_v43 }
 0x6b2   : > { %1741 = vst.msk [vmem:[%s2734_s23 + $0x30] sm:$0xff] %vm647_vm1, %v1733_v45 }
 0x6b3 PF: > { %s20_s13 = sadd.s32 1, %s2385_s13  }
 0x6b4   : > { %p17_p4 = scmp.ge.s32.totalorder %s20_s13, 4  }
 0x6b6   :  { %19 = sbr.rel (!%p17_p4) target bundleno = 1 (0x1), region = 93 }

</bundles_post_ra>
